<compile_context>
chip_gen: v5e
topology: v5e:2x2
jax: 0.10.0
libtpu: 0.0.40
codegen_flags: <defaults>
</compile_context>

<pallas_src>
import math
import functools

import jax
import jax.numpy as jnp
from jax.experimental import pallas as pl
from jax.experimental.pallas import tpu as pltpu


def _round_up(x, m):
    return ((x + m - 1) // m) * m


# ----------------------------------------------------------------------------
# Parameter setup (plain JAX): replicate F.affine_grid + F.grid_sample
# (bilinear, padding_mode='zeros', align_corners=False).
# ----------------------------------------------------------------------------
def _rotate_filter_bank(weight, angle):
    """Rotate every (C_in, k, k) filter of `weight` (C_out, C_in, k, k)."""
    c_out, c_in, k, _ = weight.shape
    cos_a = math.cos(angle)
    sin_a = math.sin(angle)

    # affine_grid normalized output coords (align_corners=False)
    coords = (2.0 * jnp.arange(k, dtype=jnp.float32) + 1.0) / k - 1.0
    gy, gx = jnp.meshgrid(coords, coords, indexing="ij")           # (k, k)
    grid_x = cos_a * gx - sin_a * gy
    grid_y = sin_a * gx + cos_a * gy

    # grid_sample un-normalization (align_corners=False)
    ix = ((grid_x + 1.0) * k - 1.0) / 2.0
    iy = ((grid_y + 1.0) * k - 1.0) / 2.0
    ix0 = jnp.floor(ix)
    iy0 = jnp.floor(iy)
    ix1 = ix0 + 1.0
    iy1 = iy0 + 1.0
    wx1 = ix - ix0
    wx0 = 1.0 - wx1
    wy1 = iy - iy0
    wy0 = 1.0 - wy1

    def gather(iyf, ixf):
        iyi = iyf.astype(jnp.int32)
        ixi = ixf.astype(jnp.int32)
        valid = ((iyi >= 0) & (iyi < k) & (ixi >= 0) & (ixi < k)).astype(weight.dtype)
        iyc = jnp.clip(iyi, 0, k - 1)
        ixc = jnp.clip(ixi, 0, k - 1)
        vals = weight[:, :, iyc, ixc]                               # (C_out, C_in, k, k)
        return vals * valid[None, None]

    return (gather(iy0, ix0) * (wy0 * wx0)[None, None]
            + gather(iy0, ix1) * (wy0 * wx1)[None, None]
            + gather(iy1, ix0) * (wy1 * wx0)[None, None]
            + gather(iy1, ix1) * (wy1 * wx1)[None, None])


# ----------------------------------------------------------------------------
# im2col, N-major: (N, K, HWpad) with K=(kh,kw,ci), HW=(ho,wo) row-major.
# With allow_input_fusion on the pallas_call operand, XLA may fuse this whole
# producer chain into the kernel's operand DMA (avoids materializing the
# k^2-inflated tensor in HBM).
# ----------------------------------------------------------------------------
def _im2col_nkm(x_nchw, k, stride, padding, out_dtype, hw_pad):
    n, c, h, w = x_nchw.shape
    xp = jnp.pad(x_nchw.astype(out_dtype),
                 ((0, 0), (0, 0), (padding, padding), (padding, padding)))
    ho = (h + 2 * padding - k) // stride + 1
    wo = (w + 2 * padding - k) // stride + 1
    cols = []
    for kh in range(k):
        for kw in range(k):
            cols.append(xp[:, :,
                           kh:kh + (ho - 1) * stride + 1:stride,
                           kw:kw + (wo - 1) * stride + 1:stride])
    p = jnp.stack(cols, axis=1)                  # (N, k*k, C, Ho, Wo)
    p = p.reshape(n, k * k * c, ho * wo)         # (N, K, HW)
    if hw_pad != ho * wo:
        p = jnp.pad(p, ((0, 0), (0, 0), (0, hw_pad - ho * wo)))
    return p


# ----------------------------------------------------------------------------
# Pallas kernel: per grid step, one (batch image, pixel-tile) block.
#   w_ref : (R*C_out_p, K)     bf16   (constant index_map -> DMA'd once)
#   p_ref : (K, TILE)          bf16   (leading batch dim squeezed)
#   o_ref : (C_out_p, TILE)    f32    (lane-dense, N-major output)
# The matmul + rotation max is strip-chunked along lanes so the f32
# accumulator stays resident in vregs (no spill before the max tree).
# ----------------------------------------------------------------------------
def _rot_conv_max_kernel(w_ref, p_ref, o_ref, *, num_rotations, c_out_p, strip):
    tile = o_ref.shape[-1]
    w = w_ref[...]                                           # (R*C_out_p, K)
    for s in range(tile // strip):
        sl = pl.ds(s * strip, strip)
        acc = jnp.dot(w, p_ref[:, sl],
                      preferred_element_type=jnp.float32)    # (R*C_out_p, strip)
        # Sublane-aligned (C_out_p multiple of 8) per-rotation row slices.
        parts = [acc[r * c_out_p:(r + 1) * c_out_p, :] for r in range(num_rotations)]
        # Balanced max tree (short dependency chain).
        while len(parts) > 1:
            nxt = [jnp.maximum(parts[i], parts[i + 1])
                   for i in range(0, len(parts) - 1, 2)]
            if len(parts) % 2:
                nxt.append(parts[-1])
            parts = nxt
        o_ref[:, sl] = parts[0].astype(o_ref.dtype)


def _pick_tile_hw(hw_pad, n_batch, k_dim, c_out_p, rco,
                  vmem_budget=12 * 1024 * 1024):
    """Largest pixel tile that (a) divides hw_pad, (b) fits a conservative
    per-step VMEM budget, and (c) leaves >=4 total grid steps when possible
    (v7x: 2 TensorCores x >=2 pipelined steps each)."""
    for t in (1024, 512, 256, 128):
        if hw_pad % t:
            continue
        # double-buffered patch tile + double-buffered f32 out tile + weights
        bytes_step = (2 * k_dim * t * 2) + (2 * c_out_p * t * 4) + (2 * rco * k_dim * 2)
        if bytes_step > vmem_budget:
            continue
        if n_batch * (hw_pad // t) >= 4 or t == 128:
            return t
    return 128


def _rot_conv_max(p_nkm, w_cat, c_out_p, num_rotations, tile_hw):
    n, k_dim, hw_pad = p_nkm.shape
    rco = w_cat.shape[0]
    strip = 128 if tile_hw == 128 else 256

    kernel = functools.partial(_rot_conv_max_kernel,
                               num_rotations=num_rotations,
                               c_out_p=c_out_p, strip=strip)
    return pl.pallas_call(
        kernel,
        out_shape=jax.ShapeDtypeStruct((n, c_out_p, hw_pad), jnp.float32),
        grid_spec=pltpu.PrefetchScalarGridSpec(
            num_scalar_prefetch=0,
            grid=(n, hw_pad // tile_hw),
            in_specs=[
                # Constant index_map: weight block is DMA'd once and kept
                # resident across grid steps.
                pl.BlockSpec((rco, k_dim), lambda b, j: (0, 0)),
                # Leading batch dim squeezed out of the kernel view.
                pl.BlockSpec((None, k_dim, tile_hw), lambda b, j: (b, 0, j)),
            ],
            out_specs=pl.BlockSpec((None, c_out_p, tile_hw), lambda b, j: (b, 0, j)),
        ),
        compiler_params=pltpu.CompilerParams(
            dimension_semantics=("parallel", "parallel"),
            vmem_limit_bytes=32 * 1024 * 1024,
            # Let XLA fuse the im2col producer of the patch operand into the
            # pallas_call instead of materializing it in HBM.
            allow_input_fusion=[False, True],
        ),
    )(w_cat, p_nkm)


# ----------------------------------------------------------------------------
# The module
# ----------------------------------------------------------------------------
class RotationEquivariantConv2dPallas:
    def __init__(self, in_channels, out_channels, kernel_size, num_rotations=8,
                 stride=1, padding=0, key=None, compute_dtype=jnp.bfloat16):
        if key is None:
            key = jax.random.PRNGKey(0)
        self.in_channels = in_channels
        self.out_channels = out_channels
        self.kernel_size = kernel_size
        self.num_rotations = num_rotations
        self.stride = stride
        self.padding = padding
        # Explicit precision choice: bf16 matmul operands, f32 accumulation,
        # f32 output (matches the module's float32 output dtype).
        self.compute_dtype = compute_dtype

        # nn.Parameter(torch.randn(...)) equivalent.
        self.weight = jax.random.normal(
            key, (out_channels, in_channels, kernel_size, kernel_size),
            dtype=jnp.float32)

        # Pre-rotate the filter bank (tiny tensors; fixed weights, so this
        # parameter setup is hoisted out of the forward pass).
        rot = [_rotate_filter_bank(self.weight, 2.0 * math.pi * r / num_rotations)
               for r in range(num_rotations)]
        self.rotated_weights = jnp.stack(rot)            # (R, C_out, C_in, k, k) f32

        # Pad C_out to a multiple of 8 so the per-rotation accumulator slices
        # in the kernel are sublane-aligned (f32 sublane tile = 8 rows).
        self.c_out_p = _round_up(out_channels, 8)
        rot_p = self.rotated_weights
        if self.c_out_p != out_channels:
            rot_p = jnp.pad(rot_p, ((0, 0), (0, self.c_out_p - out_channels),
                                    (0, 0), (0, 0), (0, 0)))
        # Concatenate rotations along the output dim: (R*C_out_p, K), K=(kh,kw,ci).
        w = jnp.transpose(rot_p, (0, 1, 3, 4, 2))         # (R, Co_p, k, k, Ci)
        self.w_cat = w.reshape(
            num_rotations * self.c_out_p,
            kernel_size * kernel_size * in_channels).astype(compute_dtype)

    def __call__(self, x_nchw):
        n, _, h, w = x_nchw.shape
        k, s, p = self.kernel_size, self.stride, self.padding
        ho = (h + 2 * p - k) // s + 1
        wo = (w + 2 * p - k) // s + 1
        hw = ho * wo
        hw_pad = _round_up(hw, 128)

        k_dim = k * k * self.in_channels
        rco = self.num_rotations * self.c_out_p
        tile_hw = _pick_tile_hw(hw_pad, n, k_dim, self.c_out_p, rco)

        p_nkm = _im2col_nkm(x_nchw, k, s, p, self.compute_dtype, hw_pad)
        out = _rot_conv_max(p_nkm, self.w_cat, self.c_out_p,
                            self.num_rotations, tile_hw)   # (N, C_out_p, hw_pad)

        # Strip padded rows/columns; when no padding was needed this slice is
        # a no-op and the reshape is free (output is already N-major/NCHW).
        out = out[:, :self.out_channels, :hw]
        return out.reshape(n, self.out_channels, ho, wo)


# ----------------------------------------------------------------------------
# Pure-JAX/XLA reference (same rotated filters) for a numeric self-check.
# ----------------------------------------------------------------------------
def _reference_forward(x_nchw, rotated_weights, stride, padding):
    outs = []
    for r in range(rotated_weights.shape[0]):
        o = jax.lax.conv_general_dilated(
            x_nchw, rotated_weights[r],
            window_strides=(stride, stride),
            padding=[(padding, padding), (padding, padding)],
            dimension_numbers=("NCHW", "OIHW", "NCHW"))
        outs.append(o)
    return jnp.max(jnp.stack(outs, axis=0), axis=0)


if __name__ == "__main__":
    key = jax.random.PRNGKey(0)
    k_w, k_x = jax.random.split(key)

    conv = RotationEquivariantConv2dPallas(
        in_channels=4, out_channels=8, kernel_size=3, num_rotations=8,
        stride=1, padding=1, key=k_w)

    x = jax.random.normal(k_x, (2, 4, 16, 16), dtype=jnp.float32)

    fwd = jax.jit(conv.__call__)
    y = jax.block_until_ready(fwd(x))

    assert y.shape == (2, 8, 16, 16), y.shape
    assert bool(jnp.all(jnp.isfinite(y)))

    # Numeric self-check vs XLA conv reference (tolerance covers bf16 operands).
    y_ref = jax.block_until_ready(
        _reference_forward(x, conv.rotated_weights, conv.stride, conv.padding))
    rel = float(jnp.linalg.norm(y - y_ref) / (jnp.linalg.norm(y_ref) + 1e-12))
    assert rel < 3e-2, f"relative L2 error too large: {rel}"

    print("KERNEL_OK")
</pallas_src>

<mosaic_0001>
module attributes {stable_mosaic.version = 11 : i64} {
  func.func @_rot_conv_max_kernel(%arg0: i32, %arg1: i32, %arg2: memref<64x36xbf16, #tpu.memory_space<vmem>>, %arg3: memref<1x36x128xbf16, #tpu.memory_space<vmem>>, %arg4: memref<1x8x128xf32, #tpu.memory_space<vmem>>) attributes {dimension_semantics = [#tpu.dimension_semantics<parallel>, #tpu.dimension_semantics<parallel>], iteration_bounds = array<i64: 2, 2>, scalar_prefetch = 0 : i64, scratch_operands = 0 : i64, tpu.core_type = #tpu.core_type<tc>, window_params = [{pipeline_mode = #tpu.pipeline_mode<synchronous>, transform_indices = @transform_0, window_bounds = array<i64: 64, 36>}, {transform_indices = @transform_1, window_bounds = array<i64: 1, 36, 128>}, {transform_indices = @transform_2, window_bounds = array<i64: 1, 8, 128>}]} {
    %c0 = arith.constant 0 : index
    %c0_0 = arith.constant 0 : index
    %0 = vector.load %arg2[%c0, %c0_0] : memref<64x36xbf16, #tpu.memory_space<vmem>>, vector<64x36xbf16>
    %c0_1 = arith.constant 0 : index
    %c0_2 = arith.constant 0 : index
    %c0_3 = arith.constant 0 : index
    %1 = vector.load %arg3[%c0_1, %c0_2, %c0_3] : memref<1x36x128xbf16, #tpu.memory_space<vmem>>, vector<1x36x128xbf16>
    %2 = vector.shape_cast %1 : vector<1x36x128xbf16> to vector<36x128xbf16>
    %cst = arith.constant dense<0.000000e+00> : vector<64x128xf32>
    %3 = tpu.matmul %0, %2, %cst {dimension_numbers = #tpu.dot_dimension_numbers<[1], [0], [0], [1], [0, 0, 1, 1], [], []>} : vector<64x36xbf16>, vector<36x128xbf16>, vector<64x128xf32> -> vector<64x128xf32>
    %4 = vector.extract_strided_slice %3 {offsets = [0, 0], sizes = [8, 128], strides = [1, 1]} : vector<64x128xf32> to vector<8x128xf32>
    %5 = vector.extract_strided_slice %3 {offsets = [8, 0], sizes = [8, 128], strides = [1, 1]} : vector<64x128xf32> to vector<8x128xf32>
    %6 = vector.extract_strided_slice %3 {offsets = [16, 0], sizes = [8, 128], strides = [1, 1]} : vector<64x128xf32> to vector<8x128xf32>
    %7 = vector.extract_strided_slice %3 {offsets = [24, 0], sizes = [8, 128], strides = [1, 1]} : vector<64x128xf32> to vector<8x128xf32>
    %8 = vector.extract_strided_slice %3 {offsets = [32, 0], sizes = [8, 128], strides = [1, 1]} : vector<64x128xf32> to vector<8x128xf32>
    %9 = vector.extract_strided_slice %3 {offsets = [40, 0], sizes = [8, 128], strides = [1, 1]} : vector<64x128xf32> to vector<8x128xf32>
    %10 = vector.extract_strided_slice %3 {offsets = [48, 0], sizes = [8, 128], strides = [1, 1]} : vector<64x128xf32> to vector<8x128xf32>
    %11 = vector.extract_strided_slice %3 {offsets = [56, 0], sizes = [8, 128], strides = [1, 1]} : vector<64x128xf32> to vector<8x128xf32>
    %12 = arith.maximumf %4, %5 : vector<8x128xf32>
    %13 = arith.maximumf %6, %7 : vector<8x128xf32>
    %14 = arith.maximumf %8, %9 : vector<8x128xf32>
    %15 = arith.maximumf %10, %11 : vector<8x128xf32>
    %16 = arith.maximumf %12, %13 : vector<8x128xf32>
    %17 = arith.maximumf %14, %15 : vector<8x128xf32>
    %18 = arith.maximumf %16, %17 : vector<8x128xf32>
    %c0_4 = arith.constant 0 : index
    %c0_5 = arith.constant 0 : index
    %c0_6 = arith.constant 0 : index
    %19 = vector.load %arg4[%c0_4, %c0_5, %c0_6] : memref<1x8x128xf32, #tpu.memory_space<vmem>>, vector<1x8x128xf32>
    %20 = vector.shape_cast %19 : vector<1x8x128xf32> to vector<8x128xf32>
    %21 = vector.shape_cast %18 : vector<8x128xf32> to vector<1x8x128xf32>
    tpu.vector_store %arg4[%c0_4, %c0_5, %c0_6], %21 {strides = array<i32>} : memref<1x8x128xf32, #tpu.memory_space<vmem>>, vector<1x8x128xf32>,
    return
  }
  func.func @transform_0(%arg0: i32, %arg1: i32) -> (i32, i32) {
    %c0_i32 = arith.constant 0 : i32
    %c0_i32_0 = arith.constant 0 : i32
    %c0_i32_1 = arith.constant 0 : i32
    return %c0_i32, %c0_i32_0 : i32, i32
  }
  func.func @transform_1(%arg0: i32, %arg1: i32) -> (i32, i32, i32) {
    %c0_i32 = arith.constant 0 : i32
    %c0_i32_0 = arith.constant 0 : i32
    return %arg0, %c0_i32, %arg1 : i32, i32, i32
  }
  func.func @transform_2(%arg0: i32, %arg1: i32) -> (i32, i32, i32) {
    %c0_i32 = arith.constant 0 : i32
    %c0_i32_0 = arith.constant 0 : i32
    return %arg0, %c0_i32, %arg1 : i32, i32, i32
  }
}

</mosaic_0001>

<bundles_post_ra>
// kernel: a_call__.1
= control target key start
LH: loop header
LB: loop body
LE: loop exit
PB: predicated region body
PF: predicated region fallthrough
CT: control target
= control target key end

     0   :  { %s601_s9 = smov 0   ;;  %s603_s10 = smov 0   ;;  %s704_s0 = inlined_call_operand.vmem [shape: bf16[64,36], index: 0, kind: input, shape index: {}]   ;;  %s705_s1 = inlined_call_operand.vmem [shape: bf16[2,36,256], index: 1, kind: input, shape index: {}]   ;;  %s706_s2 = inlined_call_operand.vmem [shape: f32[2,8,256], index: 2, kind: output, shape index: {}]  }
   0x1   :  { %s605_s11 = smov 0   ;;  %s607_s12 = smov 0  }
   0x2   :  { %s609_s13 = smov 0   ;;  %s611_s14 = smov 0  }
   0x3   :  { %s613_s15 = smov 0  }
   0x4 LB: > { %s21_s16 = sadd.s32 1, %s576_s13  ;;  %s24_s17 = sadd.s32 1, %s580_s14  ;;  %s584_s15 = sphi %s613_s15, %s12_s15   ;;  %s580_s14 = sphi %s611_s14, %s712_s14   ;;  %s576_s13 = sphi %s609_s13, %s711_s13   ;;  %s572_s12 = sphi %s607_s12, %s710_s12   ;;  %s568_s11 = sphi %s605_s11, %s709_s11   ;;  %s564_s10 = sphi %s603_s10, %s708_s10   ;;  %s560_s9 = sphi %s601_s9, %s707_s9  }
   0x5   : > { %p22_p0 = scmp.ge.s32.totalorder %s21_s16, 2  ;;  %p61_p1 = scmp.ne.s32.totalorder %s564_s10, %s560_s9 }
   0x6   : > { %p62_p2 = scmp.eq.s32.totalorder %s584_s15, 0  ;;  %s54_s21 = sadd.s32 1, %s564_s10 }
   0x7   : > { %s714_s16 = smov (%p22_p0, %s21_s16), 0  ;;  %s716_s17 = smov (!%p22_p0, %s24_s17), %s580_s14 }
   0x8   : > { %p63_p3 = por %p62_p2, %p61_p1  ;;  %p26_p4 = scmp.ge.s32.totalorder %s716_s17, 2 }
   0x9   : > { %s50_s18 = ssub.s32 %s576_s13, %s714_s16  ;;  %p421_p6 = scmp.ge.s32.totalorder %s584_s15, 4 }
   0xa   : > { %s718_s17 = smov (%p26_p4, %s716_s17), 0 }
   0xb   : > { %s49_s19 = ssub.s32 %s580_s14, %s718_s17  ;;  %118 = sbr.rel (%p421_p6) target bundleno = 28 (0x1c), region = 20 }
   0xc   : > { %s51_s20 = sor.u32 %s50_s18, %s49_s19 }
   0xd   : > { %p52_p5 = scmp.eq.s32.totalorder %s51_s20, 0 }
   0xf   : > { %s652_s22 = scalar_select %p52_p5, %s564_s10, %s54_s21  }
  0x10   : > { %121 = sbr.rel (!%p63_p3) target bundleno = 28 (0x1c), region = 24  ;;  %s123_s23 = sand.u32 (%p63_p3), 1, %s564_s10  }
  0x11   : > { %s472_s24 = smul.u32 (%p63_p3), 10, %s580_s14 }
  0x12   : > { %s471_s25 = smul.u32 (%p63_p3), 20, %s123_s23 }
  0x13   : > { %s127_s26 = sadd.s32 (%p63_p3), %s576_s13, %s472_s24 }
  0x14   : > { %s422_s27 = sshll.u32 (%p63_p3), %s127_s26, 2  ;;  %s125_s3 = scalar_lea.vmem (%p63_p3), [#allocation2], %s471_s25 }
  0x15   : > { %s129_s30 = scalar_lea.vmem %s705_s1, %s422_s27 }
  0x16   : > { %v146_v0 = vld [vmem:[%s129_s30] sm:$0xf]  ;;  %v148_v1 = vld [vmem:[%s129_s30 + $0x8] sm:$0xf]  ;;  %v150_v2 = vld [vmem:[%s129_s30 + $0x10] sm:$0xf] }
  0x17   : > { %147 = vst [vmem:[%s125_s3] sm:$0xf] %v146_v0  ;;  %v152_v3 = vld [vmem:[%s129_s30 + $0x18] sm:$0xf]  ;;  %v154_v4 = vld [vmem:[%s129_s30 + $0x20] sm:$0xf] }
  0x18   : > { %149 = vst [vmem:[%s125_s3 + $0x4] sm:$0xf] %v148_v1 }
  0x19   : > { %151 = vst [vmem:[%s125_s3 + $0x8] sm:$0xf] %v150_v2 }
  0x1a   : > { %153 = vst [vmem:[%s125_s3 + $0xc] sm:$0xf] %v152_v3 }
  0x1b   : > { %155 = vst [vmem:[%s125_s3 + $0x10] sm:$0xf] %v154_v4 }
  0x1c PF: > { %p423_p7 = scmp.ge.s32.totalorder %s584_s15, 1  ;;  %p188_p8 = scmp.lt.s32.totalorder %s584_s15, 5 }
  0x1e   : > { %p189_p9 = pnand %p423_p7, %p188_p8 }
  0x1f   : > { %s195_s4 = sand.u32 (!%p189_p9), 1, %s560_s9   ;;  %p219_p10 = scmp.lt.s32.totalorder (!%p189_p9), %s572_s12, 1 }
  0x20   : > { %192 = sbr.rel (%p189_p9) target bundleno = 202 (0xca), region = 65  ;;  %p221_p11 = scmp.lt.s32.totalorder (!%p189_p9), %s568_s11, 1 }
  0x21   : > { %s473_s5 = smul.u32 (!%p189_p9), 20, %s195_s4 }
  0x23   : > { %s197_s6 = scalar_lea.vmem (!%p189_p9), [#allocation2], %s473_s5 }
  0x25   : > { %v240_v5 = vld [vmem:[%s197_s6 + $0x10] sm:$0x3]  ;;  %vm289_vm0 = vcmask 1041408   ;;  %v461_v9 = vld [vmem:[%s197_s6 + $0x8] sm:$0xff]  ;;  %v460_v10 = vld [vmem:[%s197_s6] sm:$0xff]  ;;  %vm276_vm1 = vcmask 293888  }
  0x26   : > { %v270_v6 = vunpack.c.l.b16 %v240_v5  ;;  %v456_v11 = vld [vmem:[%s704_s0] sm:$0xff]  ;;  %v457_v12 = vld [vmem:[%s704_s0 + $0x8] sm:$0xff]  ;;  %v458_v13 = vld [vmem:[%s704_s0 + $0x10] sm:$0xff]  ;;  %s720_s12 = smov (!%p219_p10, %s572_s12), 1  ;;  %s722_s11 = smov (!%p221_p11, %s568_s11), 1 }
  0x27   : > { %v459_v14 = vld [vmem:[%s704_s0 + $0x18] sm:$0xff]  ;;  %s424_s24 = sshll.u32 %s720_s12, 1 }
  0x28   : > { %v273_v7 = vpack.c.b16 %v270_v6, %v270_v6  ;;  %s224_s25 = sadd.s32 %s424_s24, %s722_s11 }
  0x29   : > { %s425_s26 = sshll.u32 %s224_s25, 3 }
  0x2a   : > { %v291_v8 = vsel %vm289_vm0, %v273_v7, 0  ;;  %s226_s29 = scalar_lea.vmem %s706_s2, %s425_s26 }
  0x2b   : > { %298 = vmatpush.bf16.msra.mxu0 %v291_v8  ;;  %462 = vmatpush.bf16.msra.mxu1 %v291_v8 }
  0x2c   : > { %463 = vmatpush.bf16.msra.mxu2 %v291_v8  ;;  %464 = vmatpush.bf16.msra.mxu3 %v291_v8 }
  0x2f   : > { %299 = vmatpush.bf16.msra.mxu0 %v461_v9  ;;  %465 = vmatpush.bf16.msra.mxu1 %v461_v9 }
  0x30   : > { %466 = vmatpush.bf16.msra.mxu2 %v461_v9  ;;  %467 = vmatpush.bf16.msra.mxu3 %v461_v9 }
  0x33   : > { %300 = vmatpush.bf16.msra.mxu0 %v460_v10  ;;  %468 = vmatpush.bf16.msra.mxu1 %v460_v10 }
  0x34   : > { %469 = vmatpush.bf16.msra.mxu2 %v460_v10  ;;  %470 = vmatpush.bf16.msra.mxu3 %v460_v10 }
  0x36   : > { %450 = vmatmul.msk.bf16.vlgmr.msra.gmra.mxu0 %vm276_vm1, %v456_v11  ;;  %451 = vmatmul.msk.bf16.vlgmr.msra.gmra.mxu1 %vm276_vm1, %v457_v12 }
  0x37   : > { %452 = vmatmul.msk.bf16.vlgmr.msra.gmra.mxu2 %vm276_vm1, %v458_v13  ;;  %453 = vmatmul.msk.bf16.vlgmr.msra.gmra.mxu3 %vm276_vm1, %v459_v14 }
  0xb3   : > { %v302_v15 = vpop.f32.mrf.mxu0  ;;  %v307_v16 = vpop.f32.mrf.mxu1 }
  0xba   : > { %v312_v17 = vpop.f32.mrf.mxu2  ;;  %v317_v18 = vpop.f32.mrf.mxu3 }
  0xbb   : > { %v304_v19 = vpop.f32.mrf.mxu0  ;;  %v309_v20 = vpop.f32.mrf.mxu1 }
  0xbc   : > { %v322_v21 = vmax.f32 %v302_v15, %v304_v19  ;;  %v323_v22 = vmax.f32 %v307_v16, %v309_v20 }
  0xbe   : > { %v326_v27 = vmax.f32 %v322_v21, %v323_v22 }
  0xc2   : > { %v314_v23 = vpop.f32.mrf.mxu2  ;;  %v319_v24 = vpop.f32.mrf.mxu3 }
  0xc3   : > { %v324_v25 = vmax.f32 %v312_v17, %v314_v23  ;;  %v325_v26 = vmax.f32 %v317_v18, %v319_v24 }
  0xc5   : > { %v327_v28 = vmax.f32 %v324_v25, %v325_v26 }
  0xc7   : > { %v328_v29 = vmax.f32 %v326_v27, %v327_v28 }
  0xc9   : > { %329 = vst [vmem:[%s226_s29] sm:$0xff] %v328_v29 }
  0xca PF: > { %s12_s15 = sadd.s32 1, %s584_s15   ;;  %s707_s9 = smov %s564_s10 }
  0xcb   : > { %p9_p12 = scmp.ge.s32.totalorder %s12_s15, 6   ;;  %s708_s10 = smov %s652_s22 }
  0xcc   : > { %s709_s11 = smov %s576_s13  ;;  %s710_s12 = smov %s580_s14 }
  0xcd   : > { %s711_s13 = smov %s714_s16  ;;  %s712_s14 = smov %s718_s17 }
  0xce   :  { %11 = sbr.rel (!%p9_p12) target bundleno = 4 (0x4), region = 104 }

</bundles_post_ra>
